<compile_context>
chip_gen: v5e
topology: v5e:2x2
jax: 0.10.0
libtpu: 0.0.40
codegen_flags: <defaults>
</compile_context>

<pallas_src>
import functools

import jax
import jax.numpy as jnp
from jax.experimental import pallas as pl
from jax.experimental.pallas import tpu as pltpu

JITTER = 1e-20
HIDDEN = 32  # hidden width of the actor/critic MLPs (matches the repo's lin1/lin2)


def _softplus(x):
    # Numerically stable softplus = log(1 + exp(x)).
    return jnp.maximum(x, 0.0) + jnp.log1p(jnp.exp(-jnp.abs(x)))


def _relu(x):
    return jnp.maximum(x, 0.0)


# ----------------------------------------------------------------------------
# Parameter packing: 16 small arrays -> 2 contiguous f32 slabs.
# ----------------------------------------------------------------------------
def _mlp_offsets(f, h):
    """Row layout of the MLP slab (width = h). Returns (offsets, total_rows)."""
    off = {}
    r = 0
    for name, n_rows in [
        ("w1_a", f), ("b1_a", 1), ("w2_a", h), ("b2_a", 1), ("w3_a", 1),
        ("w1_c", f), ("b1_c", 1), ("w2_c", h), ("b2_c", 1), ("w3_c", 1),
        ("hb", 1),  # row 0:[b3_a], 1:[b3_c], rest zero
    ]:
        off[name] = (r, r + n_rows)
        r += n_rows
    return off, r


def _pack_params(p, f, h):
    """Concatenate the 16 parameter arrays into (gcn_slab [F+1, 2F], mlp_slab [R, H])."""
    gcn_slab = jnp.concatenate(
        [
            jnp.concatenate([p["wg_a"], p["wg_c"]], axis=1),  # [F, 2F]
            jnp.concatenate([p["bg_a"], p["bg_c"]], axis=1),  # [1, 2F]
        ],
        axis=0,
    )  # [F+1, 2F]

    hb = jnp.concatenate(
        [p["b3_a"].reshape(1, 1), p["b3_c"].reshape(1, 1),
         jnp.zeros((1, h - 2), jnp.float32)],
        axis=1,
    )  # [1, H]

    mlp_slab = jnp.concatenate(
        [
            p["w1_a"], p["b1_a"], p["w2_a"], p["b2_a"], p["w3_a"].reshape(1, h),
            p["w1_c"], p["b1_c"], p["w2_c"], p["b2_c"], p["w3_c"].reshape(1, h),
            hb,
        ],
        axis=0,
    )  # [R, H]

    off, n_rows = _mlp_offsets(f, h)
    assert mlp_slab.shape == (n_rows, h)
    return gcn_slab, mlp_slab, off


# ----------------------------------------------------------------------------
# Kernel
# ----------------------------------------------------------------------------
def _make_kernel(bc, n, f, h, off):
    """Kernel over one batch chunk: bc observations, n nodes, f features, h hidden."""

    def kernel(a_bd_ref, x_ref, gcn_ref, mlp_ref, conc_ref, value_ref):
        def rows(name):
            lo, hi = off[name]
            return mlp_ref[lo:hi, :]

        x = x_ref[...]                                           # [bc*n, f]
        a_bd = a_bd_ref[...]                                     # [bc*n, bc*n] block-diag

        # --- shared normalized-adjacency matmul (computed once) -------------
        ax = jnp.dot(a_bd, x, preferred_element_type=jnp.float32)        # [bc*n, f]

        # --- fused actor|critic GCN layer: one [f, 2f] matmul ----------------
        wg = gcn_ref[0:f, :]                                     # [f, 2f]
        bg = gcn_ref[f:f + 1, :]                                 # [1, 2f]
        gcn = _relu(jnp.dot(ax, wg, preferred_element_type=jnp.float32) + bg)
        xa = gcn[:, 0:f] + x                                     # actor residual
        xc = gcn[:, f:2 * f] + x                                 # critic residual

        # --- actor MLP -------------------------------------------------------
        a1 = _relu(jnp.dot(xa, rows("w1_a"), preferred_element_type=jnp.float32)
                   + rows("b1_a"))                               # [bc*n, h]
        a2 = _relu(jnp.dot(a1, rows("w2_a"), preferred_element_type=jnp.float32)
                   + rows("b2_a"))                               # [bc*n, h]
        # width-1 head off the MXU: VPU multiply + lane (XLU) reduce
        w3a = rows("w3_a").reshape(1, 1, h)                      # [1, 1, h]
        b3a = mlp_ref[off["hb"][0]:off["hb"][1], 0:1]            # [1, 1]
        a_out = jnp.sum(a2.reshape(bc, n, h) * w3a, axis=-1) + b3a   # [bc, n]
        conc_ref[...] = _softplus(a_out) + JITTER

        # --- critic -----------------------------------------------------------
        s = jnp.sum(xc.reshape(bc, n, f), axis=1)                # [bc, f] per-obs pool
        c1 = _relu(jnp.dot(s, rows("w1_c"), preferred_element_type=jnp.float32)
                   + rows("b1_c"))                               # [bc, h]
        c2 = _relu(jnp.dot(c1, rows("w2_c"), preferred_element_type=jnp.float32)
                   + rows("b2_c"))                               # [bc, h]
        b3c = mlp_ref[off["hb"][0]:off["hb"][1], 1:2]            # [1, 1]
        value_ref[...] = jnp.sum(c2 * rows("w3_c"), axis=-1, keepdims=True) + b3c  # [bc,1]

    return kernel


# ----------------------------------------------------------------------------
# Wrapper
# ----------------------------------------------------------------------------
@functools.partial(jax.jit, static_argnames=("grid_chunks",))
def actor_critic_forward(a_hat, x_batch, params, *, grid_chunks=2):
    """Batched forward of B independent observations.

    a_hat:   [N, N] normalized adjacency (shared graph).
    x_batch: [B, N, F] node features per observation.
    Returns (concentration [B, N], value [B]).  B=1 reproduces the module's
    single-observation `_forward_without_price` exactly.
    """
    b, n, f = x_batch.shape
    h = HIDDEN
    assert b % grid_chunks == 0, "batch must divide evenly into grid chunks"
    bc = b // grid_chunks

    x_flat = x_batch.reshape(b * n, f)                           # batch-major rows
    # Block-diagonal adjacency for one chunk (same for every chunk).
    a_bd = jnp.kron(jnp.eye(bc, dtype=a_hat.dtype), a_hat)       # [bc*n, bc*n]
    gcn_slab, mlp_slab, off = _pack_params(params, f, h)

    conc, value = pl.pallas_call(
        _make_kernel(bc, n, f, h, off),
        out_shape=(
            jax.ShapeDtypeStruct((b, n), jnp.float32),
            jax.ShapeDtypeStruct((b, 1), jnp.float32),
        ),
        grid=(grid_chunks,),
        in_specs=[
            pl.BlockSpec((bc * n, bc * n), lambda g: (0, 0)),    # block-diag A, reused
            pl.BlockSpec((bc * n, f), lambda g: (g, 0)),         # x chunk
            pl.BlockSpec(gcn_slab.shape, lambda g: (0, 0)),      # fused GCN weights
            pl.BlockSpec(mlp_slab.shape, lambda g: (0, 0)),      # packed MLP weights
        ],
        out_specs=(
            pl.BlockSpec((bc, n), lambda g: (g, 0)),
            pl.BlockSpec((bc, 1), lambda g: (g, 0)),
        ),
        compiler_params=pltpu.CompilerParams(
            dimension_semantics=("parallel",)),                  # v7x: shard over 2 TCs
    )(a_bd, x_flat, gcn_slab, mlp_slab)
    return conc, value[:, 0]


# ----------------------------------------------------------------------------
# Synthetic params / inputs / reference
# ----------------------------------------------------------------------------
def init_params(key, input_size, hidden=HIDDEN):
    """Deterministic synthetic parameters with the same shapes as the torch module.

    Torch nn.Linear(in, out) stores weight (out, in); we store the transpose
    (in, out) so the kernel can use x @ W directly — same math.
    """
    keys = jax.random.split(key, 16)
    f, h = input_size, hidden

    def w(k, shape, scale=0.1):
        return scale * jax.random.normal(k, shape, dtype=jnp.float32)

    return {
        # actor
        "wg_a": w(keys[0], (f, f)),  "bg_a": w(keys[1], (1, f)),
        "w1_a": w(keys[2], (f, h)),  "b1_a": w(keys[3], (1, h)),
        "w2_a": w(keys[4], (h, h)),  "b2_a": w(keys[5], (1, h)),
        "w3_a": w(keys[6], (h, 1)),  "b3_a": w(keys[7], (1, 1)),
        # critic
        "wg_c": w(keys[8], (f, f)),  "bg_c": w(keys[9], (1, f)),
        "w1_c": w(keys[10], (f, h)), "b1_c": w(keys[11], (1, h)),
        "w2_c": w(keys[12], (h, h)), "b2_c": w(keys[13], (1, h)),
        "w3_c": w(keys[14], (h, 1)), "b3_c": w(keys[15], (1, 1)),
    }


def make_normalized_adjacency(n):
    """Ring graph + self loops, symmetric degree normalization (GCNConv style)."""
    idx = jnp.arange(n)
    a = jnp.zeros((n, n), dtype=jnp.float32)
    a = a.at[idx, (idx + 1) % n].set(1.0)
    a = a.at[(idx + 1) % n, idx].set(1.0)
    a = a + jnp.eye(n, dtype=jnp.float32)
    deg = jnp.sum(a, axis=1)
    d_inv_sqrt = 1.0 / jnp.sqrt(deg)
    return a * d_inv_sqrt[:, None] * d_inv_sqrt[None, :]


def reference_forward(a_hat, x, p):
    """Plain-JAX reference of the single-observation forward."""
    h = jnp.maximum(a_hat @ x @ p["wg_a"] + p["bg_a"], 0.0)
    xa = h + x
    a1 = jnp.maximum(xa @ p["w1_a"] + p["b1_a"], 0.0)
    a2 = jnp.maximum(a1 @ p["w2_a"] + p["b2_a"], 0.0)
    a_out = a2 @ p["w3_a"] + p["b3_a"]
    conc = _softplus(a_out).reshape(-1) + JITTER
    hc = jnp.maximum(a_hat @ x @ p["wg_c"] + p["bg_c"], 0.0)
    xc = hc + x
    s = jnp.sum(xc, axis=0, keepdims=True)
    c1 = jnp.maximum(s @ p["w1_c"] + p["b1_c"], 0.0)
    c2 = jnp.maximum(c1 @ p["w2_c"] + p["b2_c"], 0.0)
    value = (c2 @ p["w3_c"] + p["b3_c"]).reshape(())
    return conc, value


if __name__ == "__main__":
    # n_regions=8 graph nodes, input_size (=hidden_size) = 32 features per node.
    # 16 stacked observations fill the MXU M dimension (B*N = 128 rows).
    N_REGIONS = 8
    INPUT_SIZE = 32
    BATCH = 16

    key = jax.random.PRNGKey(0)
    k_x, k_p = jax.random.split(key)

    x_batch = jax.random.normal(k_x, (BATCH, N_REGIONS, INPUT_SIZE), dtype=jnp.float32)
    a_hat = make_normalized_adjacency(N_REGIONS)
    params = init_params(k_p, INPUT_SIZE)

    # Batched forward (2 parallel grid chunks -> both v7x TensorCores).
    conc, value = actor_critic_forward(a_hat, x_batch, params, grid_chunks=2)
    conc = jax.block_until_ready(conc)
    value = jax.block_until_ready(value)

    conc_ref, value_ref = jax.vmap(
        lambda xb: reference_forward(a_hat, xb, params))(x_batch)

    assert conc.shape == (BATCH, N_REGIONS)
    assert value.shape == (BATCH,)
    assert jnp.allclose(conc, conc_ref, atol=1e-5, rtol=1e-5)
    assert jnp.allclose(value, value_ref, atol=1e-5, rtol=1e-5)
    assert bool(jnp.all(conc > 0.0))  # Dirichlet concentration must be positive

    # Single-observation path (the module's original forward signature): B=1.
    conc1, value1 = actor_critic_forward(
        a_hat, x_batch[0:1], params, grid_chunks=1)
    conc1 = jax.block_until_ready(conc1)
    c_ref1, v_ref1 = reference_forward(a_hat, x_batch[0], params)
    assert jnp.allclose(conc1[0], c_ref1, atol=1e-5, rtol=1e-5)
    assert jnp.allclose(value1[0], v_ref1, atol=1e-5, rtol=1e-5)

    print("KERNEL_OK")
</pallas_src>

<mosaic_0001>
module attributes {stable_mosaic.version = 11 : i64} {
  func.func @kernel(%arg0: i32, %arg1: memref<64x64xf32, #tpu.memory_space<vmem>>, %arg2: memref<64x32xf32, #tpu.memory_space<vmem>>, %arg3: memref<33x64xf32, #tpu.memory_space<vmem>>, %arg4: memref<135x32xf32, #tpu.memory_space<vmem>>, %arg5: memref<8x8xf32, #tpu.memory_space<vmem>>, %arg6: memref<8x1xf32, #tpu.memory_space<vmem>>) attributes {dimension_semantics = [#tpu.dimension_semantics<parallel>], iteration_bounds = array<i64: 2>, scalar_prefetch = 0 : i64, scratch_operands = 0 : i64, tpu.core_type = #tpu.core_type<tc>, window_params = [{pipeline_mode = #tpu.pipeline_mode<synchronous>, transform_indices = @transform_0, window_bounds = array<i64: 64, 64>}, {transform_indices = @transform_1, window_bounds = array<i64: 64, 32>}, {pipeline_mode = #tpu.pipeline_mode<synchronous>, transform_indices = @transform_2, window_bounds = array<i64: 33, 64>}, {pipeline_mode = #tpu.pipeline_mode<synchronous>, transform_indices = @transform_3, window_bounds = array<i64: 135, 32>}, {transform_indices = @transform_4, window_bounds = array<i64: 8, 8>}, {transform_indices = @transform_5, window_bounds = array<i64: 8, 1>}]} {
    %c0 = arith.constant 0 : index
    %c0_0 = arith.constant 0 : index
    %0 = vector.load %arg2[%c0, %c0_0] : memref<64x32xf32, #tpu.memory_space<vmem>>, vector<64x32xf32>
    %c0_1 = arith.constant 0 : index
    %c0_2 = arith.constant 0 : index
    %1 = vector.load %arg1[%c0_1, %c0_2] : memref<64x64xf32, #tpu.memory_space<vmem>>, vector<64x64xf32>
    %cst = arith.constant dense<0.000000e+00> : vector<64x32xf32>
    %2 = tpu.matmul %1, %0, %cst {dimension_numbers = #tpu.dot_dimension_numbers<[1], [0], [0], [1], [0, 0, 1, 1], [], []>} : vector<64x64xf32>, vector<64x32xf32>, vector<64x32xf32> -> vector<64x32xf32>
    %c0_3 = arith.constant 0 : index
    %c0_4 = arith.constant 0 : index
    %3 = vector.load %arg3[%c0_3, %c0_4] : memref<33x64xf32, #tpu.memory_space<vmem>>, vector<32x64xf32>
    %c32 = arith.constant 32 : index
    %c0_5 = arith.constant 0 : index
    %4 = vector.load %arg3[%c32, %c0_5] : memref<33x64xf32, #tpu.memory_space<vmem>>, vector<1x64xf32>
    %cst_6 = arith.constant dense<0.000000e+00> : vector<64x64xf32>
    %5 = tpu.matmul %2, %3, %cst_6 {dimension_numbers = #tpu.dot_dimension_numbers<[1], [0], [0], [1], [0, 0, 1, 1], [], []>} : vector<64x32xf32>, vector<32x64xf32>, vector<64x64xf32> -> vector<64x64xf32>
    %6 = vector.broadcast %4 : vector<1x64xf32> to vector<64x64xf32>
    %7 = arith.addf %5, %6 : vector<64x64xf32>
    %cst_7 = arith.constant 0.000000e+00 : f32
    %8 = vector.broadcast %cst_7 : f32 to vector<64x64xf32>
    %9 = arith.maximumf %7, %8 : vector<64x64xf32>
    %10 = vector.extract_strided_slice %9 {offsets = [0, 0], sizes = [64, 32], strides = [1, 1]} : vector<64x64xf32> to vector<64x32xf32>
    %11 = arith.addf %10, %0 : vector<64x32xf32>
    %12 = vector.extract_strided_slice %9 {offsets = [0, 32], sizes = [64, 32], strides = [1, 1]} : vector<64x64xf32> to vector<64x32xf32>
    %13 = arith.addf %12, %0 : vector<64x32xf32>
    %c0_8 = arith.constant 0 : index
    %c0_9 = arith.constant 0 : index
    %14 = vector.load %arg4[%c0_8, %c0_9] : memref<135x32xf32, #tpu.memory_space<vmem>>, vector<32x32xf32>
    %cst_10 = arith.constant dense<0.000000e+00> : vector<64x32xf32>
    %15 = tpu.matmul %11, %14, %cst_10 {dimension_numbers = #tpu.dot_dimension_numbers<[1], [0], [0], [1], [0, 0, 1, 1], [], []>} : vector<64x32xf32>, vector<32x32xf32>, vector<64x32xf32> -> vector<64x32xf32>
    %c32_11 = arith.constant 32 : index
    %c0_12 = arith.constant 0 : index
    %16 = vector.load %arg4[%c32_11, %c0_12] : memref<135x32xf32, #tpu.memory_space<vmem>>, vector<1x32xf32>
    %17 = vector.broadcast %16 : vector<1x32xf32> to vector<64x32xf32>
    %18 = arith.addf %15, %17 : vector<64x32xf32>
    %cst_13 = arith.constant 0.000000e+00 : f32
    %19 = vector.broadcast %cst_13 : f32 to vector<64x32xf32>
    %20 = arith.maximumf %18, %19 : vector<64x32xf32>
    %c33 = arith.constant 33 : index
    %c0_14 = arith.constant 0 : index
    %21 = vector.load %arg4[%c33, %c0_14] : memref<135x32xf32, #tpu.memory_space<vmem>>, vector<32x32xf32>
    %cst_15 = arith.constant dense<0.000000e+00> : vector<64x32xf32>
    %22 = tpu.matmul %20, %21, %cst_15 {dimension_numbers = #tpu.dot_dimension_numbers<[1], [0], [0], [1], [0, 0, 1, 1], [], []>} : vector<64x32xf32>, vector<32x32xf32>, vector<64x32xf32> -> vector<64x32xf32>
    %c65 = arith.constant 65 : index
    %c0_16 = arith.constant 0 : index
    %23 = vector.load %arg4[%c65, %c0_16] : memref<135x32xf32, #tpu.memory_space<vmem>>, vector<1x32xf32>
    %24 = vector.broadcast %23 : vector<1x32xf32> to vector<64x32xf32>
    %25 = arith.addf %22, %24 : vector<64x32xf32>
    %cst_17 = arith.constant 0.000000e+00 : f32
    %26 = vector.broadcast %cst_17 : f32 to vector<64x32xf32>
    %27 = arith.maximumf %25, %26 : vector<64x32xf32>
    %c66 = arith.constant 66 : index
    %c0_18 = arith.constant 0 : index
    %28 = vector.load %arg4[%c66, %c0_18] : memref<135x32xf32, #tpu.memory_space<vmem>>, vector<1x32xf32>
    %29 = vector.shape_cast %28 : vector<1x32xf32> to vector<1x1x32xf32>
    %c134 = arith.constant 134 : index
    %c0_19 = arith.constant 0 : index
    %30 = vector.load %arg4[%c134, %c0_19] : memref<135x32xf32, #tpu.memory_space<vmem>>, vector<1x1xf32>
    %31 = vector.shape_cast %27 : vector<64x32xf32> to vector<8x8x32xf32>
    %32 = vector.broadcast %29 : vector<1x1x32xf32> to vector<8x8x32xf32>
    %33 = arith.mulf %31, %32 : vector<8x8x32xf32>
    %cst_20 = arith.constant dense<0.000000e+00> : vector<8x8xf32>
    %34 = vector.multi_reduction <add>, %33, %cst_20 [2] : vector<8x8x32xf32> to vector<8x8xf32>
    %35 = vector.broadcast %30 : vector<1x1xf32> to vector<8x8xf32>
    %36 = arith.addf %34, %35 : vector<8x8xf32>
    %cst_21 = arith.constant 0.000000e+00 : f32
    %37 = vector.broadcast %cst_21 : f32 to vector<8x8xf32>
    %38 = arith.maximumf %36, %37 : vector<8x8xf32>
    %39 = math.absf %36 : vector<8x8xf32>
    %cst_22 = arith.constant 0.000000e+00 : f32
    %40 = vector.broadcast %cst_22 : f32 to vector<8x8xf32>
    %41 = arith.subf %40, %39 : vector<8x8xf32>
    %42 = math.exp %41 : vector<8x8xf32>
    %43 = math.log1p %42 : vector<8x8xf32>
    %44 = arith.addf %38, %43 : vector<8x8xf32>
    %cst_23 = arith.constant 9.99999968E-21 : f32
    %45 = vector.broadcast %cst_23 : f32 to vector<8x8xf32>
    %46 = arith.addf %44, %45 : vector<8x8xf32>
    %c0_24 = arith.constant 0 : index
    %c0_25 = arith.constant 0 : index
    %47 = vector.load %arg5[%c0_24, %c0_25] : memref<8x8xf32, #tpu.memory_space<vmem>>, vector<8x8xf32>
    tpu.vector_store %arg5[%c0_24, %c0_25], %46 {strides = array<i32>} : memref<8x8xf32, #tpu.memory_space<vmem>>, vector<8x8xf32>,
    %48 = vector.shape_cast %13 : vector<64x32xf32> to vector<8x8x32xf32>
    %cst_26 = arith.constant dense<0.000000e+00> : vector<8x32xf32>
    %49 = vector.multi_reduction <add>, %48, %cst_26 [1] : vector<8x8x32xf32> to vector<8x32xf32>
    %c67 = arith.constant 67 : index
    %c0_27 = arith.constant 0 : index
    %50 = vector.load %arg4[%c67, %c0_27] : memref<135x32xf32, #tpu.memory_space<vmem>>, vector<32x32xf32>
    %cst_28 = arith.constant dense<0.000000e+00> : vector<8x32xf32>
    %51 = tpu.matmul %49, %50, %cst_28 {dimension_numbers = #tpu.dot_dimension_numbers<[1], [0], [0], [1], [0, 0, 1, 1], [], []>} : vector<8x32xf32>, vector<32x32xf32>, vector<8x32xf32> -> vector<8x32xf32>
    %c99 = arith.constant 99 : index
    %c0_29 = arith.constant 0 : index
    %52 = vector.load %arg4[%c99, %c0_29] : memref<135x32xf32, #tpu.memory_space<vmem>>, vector<1x32xf32>
    %53 = vector.broadcast %52 : vector<1x32xf32> to vector<8x32xf32>
    %54 = arith.addf %51, %53 : vector<8x32xf32>
    %cst_30 = arith.constant 0.000000e+00 : f32
    %55 = vector.broadcast %cst_30 : f32 to vector<8x32xf32>
    %56 = arith.maximumf %54, %55 : vector<8x32xf32>
    %c100 = arith.constant 100 : index
    %c0_31 = arith.constant 0 : index
    %57 = vector.load %arg4[%c100, %c0_31] : memref<135x32xf32, #tpu.memory_space<vmem>>, vector<32x32xf32>
    %cst_32 = arith.constant dense<0.000000e+00> : vector<8x32xf32>
    %58 = tpu.matmul %56, %57, %cst_32 {dimension_numbers = #tpu.dot_dimension_numbers<[1], [0], [0], [1], [0, 0, 1, 1], [], []>} : vector<8x32xf32>, vector<32x32xf32>, vector<8x32xf32> -> vector<8x32xf32>
    %c132 = arith.constant 132 : index
    %c0_33 = arith.constant 0 : index
    %59 = vector.load %arg4[%c132, %c0_33] : memref<135x32xf32, #tpu.memory_space<vmem>>, vector<1x32xf32>
    %60 = vector.broadcast %59 : vector<1x32xf32> to vector<8x32xf32>
    %61 = arith.addf %58, %60 : vector<8x32xf32>
    %cst_34 = arith.constant 0.000000e+00 : f32
    %62 = vector.broadcast %cst_34 : f32 to vector<8x32xf32>
    %63 = arith.maximumf %61, %62 : vector<8x32xf32>
    %c134_35 = arith.constant 134 : index
    %c1 = arith.constant 1 : index
    %64 = vector.load %arg4[%c134_35, %c1] : memref<135x32xf32, #tpu.memory_space<vmem>>, vector<1x1xf32>
    %c133 = arith.constant 133 : index
    %c0_36 = arith.constant 0 : index
    %65 = vector.load %arg4[%c133, %c0_36] : memref<135x32xf32, #tpu.memory_space<vmem>>, vector<1x32xf32>
    %66 = vector.broadcast %65 : vector<1x32xf32> to vector<8x32xf32>
    %67 = arith.mulf %63, %66 : vector<8x32xf32>
    %cst_37 = arith.constant dense<0.000000e+00> : vector<8xf32>
    %68 = vector.multi_reduction <add>, %67, %cst_37 [1] : vector<8x32xf32> to vector<8xf32>
    %69 = vector.shape_cast %68 : vector<8xf32> to vector<8x1xf32>
    %70 = vector.broadcast %64 : vector<1x1xf32> to vector<8x1xf32>
    %71 = arith.addf %69, %70 : vector<8x1xf32>
    %c0_38 = arith.constant 0 : index
    %c0_39 = arith.constant 0 : index
    %72 = vector.load %arg6[%c0_38, %c0_39] : memref<8x1xf32, #tpu.memory_space<vmem>>, vector<8x1xf32>
    tpu.vector_store %arg6[%c0_38, %c0_39], %71 {strides = array<i32>} : memref<8x1xf32, #tpu.memory_space<vmem>>, vector<8x1xf32>,
    return
  }
  func.func @transform_0(%arg0: i32) -> (i32, i32) {
    %c0_i32 = arith.constant 0 : i32
    %c0_i32_0 = arith.constant 0 : i32
    %c0_i32_1 = arith.constant 0 : i32
    return %c0_i32, %c0_i32_0 : i32, i32
  }
  func.func @transform_1(%arg0: i32) -> (i32, i32) {
    %c0_i32 = arith.constant 0 : i32
    %c0_i32_0 = arith.constant 0 : i32
    return %arg0, %c0_i32 : i32, i32
  }
  func.func @transform_2(%arg0: i32) -> (i32, i32) {
    %c0_i32 = arith.constant 0 : i32
    %c0_i32_0 = arith.constant 0 : i32
    %c0_i32_1 = arith.constant 0 : i32
    return %c0_i32, %c0_i32_0 : i32, i32
  }
  func.func @transform_3(%arg0: i32) -> (i32, i32) {
    %c0_i32 = arith.constant 0 : i32
    %c0_i32_0 = arith.constant 0 : i32
    %c0_i32_1 = arith.constant 0 : i32
    return %c0_i32, %c0_i32_0 : i32, i32
  }
  func.func @transform_4(%arg0: i32) -> (i32, i32) {
    %c0_i32 = arith.constant 0 : i32
    %c0_i32_0 = arith.constant 0 : i32
    return %arg0, %c0_i32 : i32, i32
  }
  func.func @transform_5(%arg0: i32) -> (i32, i32) {
    %c0_i32 = arith.constant 0 : i32
    %c0_i32_0 = arith.constant 0 : i32
    return %arg0, %c0_i32 : i32, i32
  }
}

</mosaic_0001>

<bundles_post_ra>
// kernel: actor_critic_forward.1
= control target key start
LH: loop header
LB: loop body
LE: loop exit
PB: predicated region body
PF: predicated region fallthrough
CT: control target
= control target key end

     0   :  { %s1185_s18 = smov 0   ;;  %s1541_s0 = inlined_call_operand.vmem [shape: f32[64,64], index: 0, kind: input, shape index: {}]   ;;  %s1542_s1 = inlined_call_operand.vmem [shape: f32[128,32], index: 1, kind: input, shape index: {}]   ;;  %s1543_s2 = inlined_call_operand.vmem [shape: f32[33,64], index: 2, kind: input, shape index: {}]   ;;  %s1544_s3 = inlined_call_operand.vmem [shape: f32[135,32], index: 3, kind: input, shape index: {}]   ;;  %s1545_s4 = inlined_call_operand.vmem [shape: f32[16,8], index: 4, kind: output, shape index: {0}]   ;;  %s1546_s5 = inlined_call_operand.vmem [shape: f32[16,1], index: 5, kind: output, shape index: {1}]  }
   0x1 LB: > { %s1191_s19 = sadd.s32 4294967295, %s1150_s18   ;;  %p1050_p0 = scmp.ge.s32.totalorder %s1150_s18, 1  ;;  %s1150_s18 = sphi %s1185_s18, %s16_s18  }
   0x2   : > { %p191_p1 = scmp.lt.s32.totalorder %s1150_s18, 3 }
   0x4   : > { %p192_p2 = pnand %p1050_p0, %p191_p1 }
   0x5   : > { %s1051_s20 = sshll.u32 (!%p192_p2), %s1191_s19, 3  ;;  %s1152_s29 = smov (!%p192_p2), 32  }
   0x6   : > { %195 = sbr.rel (%p192_p2) target bundleno = 928 (0x3a0), region = 36  ;;  %p223_p3 = scmp.lt.s32.totalorder (!%p192_p2), %s1051_s20, 15 }
   0x7   : > { %s1153_s22 = smov (!%p192_p2), 96   ;;  %s1154_s8 = smov (!%p192_p2), 127  }
   0x8   : > { %p228_p4 = scmp.lt.s32.totalorder (!%p192_p2), %s1191_s19, 1 }
   0xb   : > { %s1558_s20 = smov (!%p223_p3, %s1051_s20), 15  ;;  %v244_v8 = vld [vmem:[%s1541_s0] sm:$0xff]  ;;  %vm252_vm0 = vcmask 523264   ;;  %v245_v9 = vld [vmem:[%s1541_s0 + $0x8] sm:$0xff]  ;;  %v246_v10 = vld [vmem:[%s1541_s0 + $0x10] sm:$0xff]  ;;  %vm324_vm1 = vcmask 261120  }
   0xc   : > { %s1052_s21 = sshll.u32 %s1558_s20, 3  ;;  %v247_v11 = vld [vmem:[%s1541_s0 + $0x18] sm:$0xff]  ;;  %v320_v13 = vld [vmem:[%s1543_s2 + $0x10] sm:$0xff]  ;;  %v319_v14 = vld [vmem:[%s1543_s2 + $0x8] sm:$0xff]  ;;  %vm814_vm2 = vcmask 523520   ;;  %vm797_vm3 = vcmask 1041409  }
   0xd   : > { %s226_s24 = scalar_lea.vmem %s1542_s1, %s1052_s21  ;;  %v321_v12 = vld [vmem:[%s1543_s2 + $0x18] sm:$0xff]  ;;  %v248_v15 = vld [vmem:[%s1541_s0 + $0x20] sm:$0xff]  ;;  %v249_v16 = vld [vmem:[%s1541_s0 + $0x28] sm:$0xff]  ;;  %vm799_vm4 = vcmask 1042434   ;;  %vm801_vm5 = vcmask 1043459   ;;  %vm803_vm6 = vcmask 1044484  }
   0xe   : > { %v1199_v0 = vld [vmem:[%s226_s24 + $0x38] sm:$0xff]  ;;  %v1201_v1 = vld [vmem:[%s226_s24 + $0x30] sm:$0xff]  ;;  %v1204_v2 = vld [vmem:[%s226_s24 + $0x28] sm:$0xff]  ;;  %361 = vmatpush.msra.mxu1 %v321_v12  ;;  %vm805_vm7 = vcmask 1045509   ;;  %vm807_vm8 = vcmask 1046534   ;;  %vm809_vm9 = vcmask 1047559  }
   0xf   : > { %285 = vmatpush.msra.mxu0 %v1199_v0  ;;  %v1207_v3 = vld [vmem:[%s226_s24 + $0x20] sm:$0xff]  ;;  %v1210_v4 = vld [vmem:[%s226_s24 + $0x18] sm:$0xff]  ;;  %v1213_v5 = vld [vmem:[%s226_s24 + $0x10] sm:$0xff]  ;;  %s1560_s19 = smov (!%p228_p4, %s1191_s19), 1 }
  0x10   : > { %v1216_v6 = vld [vmem:[%s226_s24 + $0x8] sm:$0xff]  ;;  %v1219_v7 = vld [vmem:[%s226_s24] sm:$0xff]  ;;  %418 = vrot.lane.b32.xlu1 %v1213_v5, %s1152_s29  ;;  %422 = vrot.lane.b32.xlu2 %v1207_v3, %s1152_s29  ;;  %s1053_s9 = sshll.u32 %s1560_s19, 3 }
  0x11   : > { %286 = vmatpush.msra.mxu0 %v1201_v1  ;;  %414 = vrot.lane.b32.xlu0 %v1219_v7, %s1152_s29  ;;  %v250_v17 = vld [vmem:[%s1541_s0 + $0x30] sm:$0xff]  ;;  %v251_v18 = vld [vmem:[%s1541_s0 + $0x38] sm:$0xff]  ;;  %v318_v19 = vld [vmem:[%s1543_s2] sm:$0xff]  ;;  %s231_s12 = scalar_lea.vmem %s1545_s4, %s1053_s9  ;;  %s235_s14 = scalar_lea.vmem %s1546_s5, %s1053_s9 }
  0x12   : > { %362 = vmatpush.msra.mxu1 %v320_v13  ;;  %v449_v28 = vld [vmem:[%s1544_s3 + $0x18] sm:$0xff]  ;;  %v448_v29 = vld [vmem:[%s1544_s3 + $0x10] sm:$0xff]  ;;  %v447_v30 = vld [vmem:[%s1544_s3 + $0x8] sm:$0xff] }
  0x13   : > { %287 = vmatpush.msra.mxu0 %v1204_v2  ;;  %488 = vmatpush.msra.mxu2 %v449_v28  ;;  %v446_v31 = vld [vmem:[%s1544_s3] sm:$0xff]  ;;  %v873_v13 = vld [vmem:[%s1544_s3 + $0x53] sm:$0xff] }
  0x14   : > { %363 = vmatpush.msra.mxu1 %v319_v14  ;;  %v1298_v32 = vld [vmem:[%s1543_s2 + $0x20] ss:$0 sm:$0xff] }
  0x15   : > { %288 = vmatpush.msra.mxu0 %v1207_v3  ;;  %489 = vmatpush.msra.mxu2 %v448_v29  ;;  %v874_v12 = vld [vmem:[%s1544_s3 + $0x5b] sm:$0xff] }
  0x16   : > { %364 = vmatpush.msra.mxu1 %v318_v19  ;;  %v528_v14 = vld [vmem:[%s1544_s3 + $0x39] sm:$0xff] }
  0x17   : > { %289 = vmatpush.msra.mxu0 %v1210_v4  ;;  %490 = vmatpush.msra.mxu2 %v447_v30 }
  0x18   : > { %420 = vrot.lane.b32.xlu1 %v1210_v4, %s1152_s29  ;;  %424 = vrot.lane.b32.xlu2 %v1204_v2, %s1152_s29 }
  0x19   : > { %290 = vmatpush.msra.mxu0 %v1213_v5  ;;  %416 = vrot.lane.b32.xlu0 %v1216_v6, %s1152_s29 }
  0x1a   : > { %491 = vmatpush.msra.mxu2 %v446_v31  ;;  %908 = vmatpush.msrb.mxu1 %v874_v12 }
  0x1b   : > { %291 = vmatpush.msra.mxu0 %v1216_v6  ;;  %567 = vmatpush.msra.mxu3 %v528_v14 }
  0x1c   : > { %909 = vmatpush.msrb.mxu1 %v873_v13 }
  0x1d   : > { %292 = vmatpush.msra.mxu0 %v1219_v7 }
  0x1e   : > { %1055 = vmatmul.msk.f32.vlgmr.msra.gmra.mxu0 %vm252_vm0, %v244_v8 }
  0x20   : > { %428 = vrot.lane.b32.xlu1 %v1199_v0, %s1152_s29 }
  0x21   : > { %426 = vrot.lane.b32.xlu0 %v1201_v1, %s1152_s29 }
  0x26   : > { %1056 = vmatmul.msk.f32.gmra.mxu0 %vm252_vm0, %v245_v9 }
  0x2e   : > { %1057 = vmatmul.msk.f32.gmra.mxu0 %vm252_vm0, %v246_v10 }
  0x36   : > { %1058 = vmatmul.msk.f32.gmra.mxu0 %vm252_vm0, %v247_v11 }
  0x3e   : > { %1059 = vmatmul.msk.f32.gmra.mxu0 %vm252_vm0, %v248_v15 }
  0x46   : > { %1060 = vmatmul.msk.f32.gmra.mxu0 %vm252_vm0, %v249_v16 }
  0x4e   : > { %1061 = vmatmul.msk.f32.gmra.mxu0 %vm252_vm0, %v250_v17 }
  0x56   : > { %1062 = vmatmul.msk.f32.gmra.mxu0 %vm252_vm0, %v251_v18  ;;  %v872_v18 = vld [vmem:[%s1544_s3 + $0x4b] sm:$0xff] }
  0x57   : > { %910 = vmatpush.msrb.mxu1 %v872_v18 }
  0x6a   : > { %v423_v52 = vpop.permute.xlu2 %422 }
  0x82   : > { %v419_v49 = vpop.permute.xlu1 %418 }
  0x83   : > { %v415_v47 = vpop.permute.xlu0 %414 }
  0x8a   : > { %v421_v57 = vpop.permute.xlu1 %420 }
  0x8b   : > { %v417_v55 = vpop.permute.xlu0 %416 }
  0x9b   : > { %v294_v20 = vpop.f32.mrf.mxu0 }
  0x9c   : > { %1063 = vmatmul.msk.f32.vlgmr.msra.gmra.mxu1 %vm324_vm1, %v294_v20 }
  0xa3   : > { %v297_v21 = vpop.f32.mrf.mxu0 }
  0xa4   : > { %1064 = vmatmul.msk.f32.gmra.mxu1 %vm324_vm1, %v297_v21 }
  0xab   : > { %v300_v22 = vpop.f32.mrf.mxu0 }
  0xac   : > { %1065 = vmatmul.msk.f32.gmra.mxu1 %vm324_vm1, %v300_v22 }
  0xb3   : > { %v303_v23 = vpop.f32.mrf.mxu0 }
  0xb4   : > { %1066 = vmatmul.msk.f32.gmra.mxu1 %vm324_vm1, %v303_v23 }
  0xbb   : > { %v306_v24 = vpop.f32.mrf.mxu0 }
  0xbc   : > { %1067 = vmatmul.msk.f32.gmra.mxu1 %vm324_vm1, %v306_v24 }
  0xc3   : > { %v309_v25 = vpop.f32.mrf.mxu0 }
  0xc4   : > { %1068 = vmatmul.msk.f32.gmra.mxu1 %vm324_vm1, %v309_v25 }
  0xcb   : > { %v312_v26 = vpop.f32.mrf.mxu0 }
  0xcc   : > { %1069 = vmatmul.msk.f32.gmra.mxu1 %vm324_vm1, %v312_v26  ;;  %v427_v26 = vpop.permute.xlu0 %426 }
  0xd3   : > { %v315_v27 = vpop.f32.mrf.mxu0 }
  0xd4   : > { %1070 = vmatmul.msk.f32.gmra.mxu1 %vm324_vm1, %v315_v27 }
 0x119   : > { %v366_v33 = vpop.f32.mrf.mxu1 }
 0x11a   : > { %v367_v34 = vadd.f32 %v1298_v32, %v366_v33 }
 0x11c   : > { %v390_v35 = vmax.f32 %v367_v34, 0.0 }
 0x11e   : > { %v398_v36 = vadd.f32 %v390_v35, %v1219_v7  ;;  %v438_v61 = vadd.f32 %v415_v47, %v390_v35 }
 0x120   : > { %1071 = vmatmul.msk.f32.vlgmr.msra.gmra.mxu2 %vm324_vm1, %v398_v36 }
 0x121   : > { %v369_v37 = vpop.f32.mrf.mxu1 }
 0x122   : > { %v370_v38 = vadd.f32 %v1298_v32, %v369_v37 }
 0x124   : > { %v391_v39 = vmax.f32 %v370_v38, 0.0 }
 0x126   : > { %v399_v40 = vadd.f32 %v391_v39, %v1216_v6  ;;  %v439_v58 = vadd.f32 %v417_v55, %v391_v39 }
 0x128   : > { %1072 = vmatmul.msk.f32.gmra.mxu2 %vm324_vm1, %v399_v40  ;;  %v822_v6 = vsel %vm814_vm2, %v439_v58, 0.0 }
 0x129   : > { %v372_v41 = vpop.f32.mrf.mxu1  ;;  %v823_v15 = vrot.slane %v822_v6, 4 }
 0x12a   : > { %v373_v42 = vadd.f32 %v1298_v32, %v372_v41 }
 0x12b   : > { %v824_v24 = vadd.f32 %v823_v15, %v822_v6 }
 0x12c   : > { %v392_v43 = vmax.f32 %v373_v42, 0.0 }
 0x12d   : > { %v825_v35 = vrot.slane %v824_v24, 2 }
 0x12e   : > { %v400_v44 = vadd.f32 %v392_v43, %v1213_v5  ;;  %v440_v59 = vadd.f32 %v419_v49, %v392_v43  ;;  %v425_v5 = vpop.permute.xlu2 %424 }
 0x130   : > { %1073 = vmatmul.msk.f32.gmra.mxu2 %vm324_vm1, %v400_v44  ;;  %v829_v8 = vsel %vm814_vm2, %v440_v59, 0.0 }
 0x131   : > { %v375_v45 = vpop.f32.mrf.mxu1  ;;  %v830_v17 = vrot.slane %v829_v8, 4 }
 0x132   : > { %v376_v46 = vadd.f32 %v1298_v32, %v375_v45  ;;  %v826_v45 = vadd.f32 %v825_v35, %v824_v24  ;;  %v525_v24 = vld [vmem:[%s1544_s3 + $0x21] sm:$0xff] }
 0x133   : > { %v831_v27 = vadd.f32 %v830_v17, %v829_v8 }
 0x134   : > { %v393_v48 = vmax.f32 %v376_v46, 0.0 }
 0x135   : > { %v832_v37 = vrot.slane %v831_v27, 2 }
 0x136   : > { %v401_v50 = vadd.f32 %v393_v48, %v1210_v4  ;;  %v441_v62 = vadd.f32 %v421_v57, %v393_v48  ;;  %v429_v48 = vpop.permute.xlu1 %428 }
 0x138   : > { %1074 = vmatmul.msk.f32.gmra.mxu2 %vm324_vm1, %v401_v50  ;;  %v836_v9 = vsel %vm814_vm2, %v441_v62, 0.0 }
 0x139   : > { %v378_v51 = vpop.f32.mrf.mxu1  ;;  %v837_v20 = vrot.slane %v836_v9, 4 }
 0x13a   : > { %v379_v53 = vadd.f32 %v1298_v32, %v378_v51 }
 0x13b   : > { %v838_v30 = vadd.f32 %v837_v20, %v836_v9 }
 0x13c   : > { %v394_v54 = vmax.f32 %v379_v53, 0.0 }
 0x13d   : > { %v839_v40 = vrot.slane %v838_v30, 2 }
 0x13e   : > { %v402_v56 = vadd.f32 %v394_v54, %v1207_v3  ;;  %v442_v4 = vadd.f32 %v423_v52, %v394_v54  ;;  %v815_v3 = vsel %vm814_vm2, %v438_v61, 0.0 }
 0x13f   : > { %v816_v19 = vrot.slane %v815_v3, 4  ;;  %v840_v51 = vadd.f32 %v839_v40, %v838_v30 }
 0x140   : > { %1075 = vmatmul.msk.f32.gmra.mxu2 %vm324_vm1, %v402_v56  ;;  %v843_v16 = vsel %vm814_vm2, %v442_v4, 0.0  ;;  %v827_v56 = vrot.slane %v826_v45, 1 }
 0x141   : > { %v381_v60 = vpop.f32.mrf.mxu1  ;;  %v844_v22 = vrot.slane %v843_v16, 4  ;;  %v817_v29 = vadd.f32 %v816_v19, %v815_v3  ;;  %v841_v61 = vrot.slane %v840_v51, 1 }
 0x142   : > { %v382_v63 = vadd.f32 %v1298_v32, %v381_v60  ;;  %v828_v4 = vadd.f32 %v827_v56, %v826_v45  ;;  %v1106_v56 = vld [vmem:[%s1544_s3 + $0x41] ss:$0 sm:$0xff] }
 0x143   : > { %v845_v31 = vadd.f32 %v844_v22, %v843_v16  ;;  %v818_v39 = vrot.slane %v817_v29, 2  ;;  %v842_v3 = vadd.f32 %v841_v61, %v840_v51  ;;  %v527_v22 = vld [vmem:[%s1544_s3 + $0x31] sm:$0xff] }
 0x144   : > { %v395_v7 = vmax.f32 %v382_v63, 0.0  ;;  %568 = vmatpush.msra.mxu3 %v527_v22 }
 0x145   : > { %v846_v43 = vrot.slane %v845_v31, 2  ;;  %v819_v50 = vadd.f32 %v818_v39, %v817_v29 }
 0x146   : > { %v403_v10 = vadd.f32 %v395_v7, %v1204_v2  ;;  %v443_v11 = vadd.f32 %v425_v5, %v395_v7 }
 0x147   : > { %v847_v53 = vadd.f32 %v846_v43, %v845_v31  ;;  %v918_v43 = vld [vmem:[%s1544_s3 + $0x6c] sm:$0xff] }
 0x148   : > { %v850_v2 = vsel %vm814_vm2, %v443_v11, 0.0  ;;  %1076 = vmatmul.msk.f32.gmra.mxu2 %vm324_vm1, %v403_v10 }
 0x149   : > { %v384_v21 = vpop.f32.mrf.mxu1  ;;  %v851_v25 = vrot.slane %v850_v2, 4  ;;  %v848_v63 = vrot.slane %v847_v53, 1 }
 0x14a   : > { %v385_v23 = vadd.f32 %v1298_v32, %v384_v21 }
 0x14b   : > { %v852_v36 = vadd.f32 %v851_v25, %v850_v2  ;;  %v849_v10 = vadd.f32 %v848_v63, %v847_v53  ;;  %v871_v25 = vld [vmem:[%s1544_s3 + $0x43] sm:$0xff] }
 0x14c   : > { %v396_v28 = vmax.f32 %v385_v23, 0.0  ;;  %v526_v23 = vld [vmem:[%s1544_s3 + $0x29] sm:$0xff]  ;;  %911 = vmatpush.msrb.mxu1 %v871_v25 }
 0x14d   : > { %v853_v46 = vrot.slane %v852_v36, 2  ;;  %569 = vmatpush.msra.mxu3 %v526_v23 }
 0x14e   : > { %v404_v33 = vadd.f32 %v396_v28, %v1201_v1  ;;  %v444_v34 = vadd.f32 %v427_v26, %v396_v28  ;;  %v833_v1 = vadd.f32 %v832_v37, %v831_v27  ;;  %v1105_v26 = vld [vmem:[%s1544_s3 + $0x20] ss:$0 sm:$0xff] }
 0x14f   : > { %v854_v57 = vadd.f32 %v853_v46, %v852_v36  ;;  %570 = vmatpush.msra.mxu3 %v525_v24 }
 0x150   : > { %v857_v38 = vsel %vm814_vm2, %v444_v34, 0.0  ;;  %1077 = vmatmul.msk.f32.gmra.mxu2 %vm324_vm1, %v404_v33  ;;  %v834_v58 = vrot.slane %v833_v1, 1 }
 0x151   : > { %v858_v41 = vrot.slane %v857_v38, 4  ;;  %v387_v42 = vpop.f32.mrf.mxu1  ;;  %v855_v5 = vrot.slane %v854_v57, 1 }
 0x152   : > { %v388_v44 = vadd.f32 %v1298_v32, %v387_v42  ;;  %v820_v32 = vrot.slane %v819_v50, 1  ;;  %v835_v7 = vadd.f32 %v834_v58, %v833_v1  ;;  %v919_v42 = vld [vmem:[%s1544_s3 + $0x74] sm:$0xff] }
 0x153   : > { %v859_v47 = vadd.f32 %v858_v41, %v857_v38  ;;  %v856_v12 = vadd.f32 %v855_v5, %v854_v57  ;;  %v920_v41 = vld [vmem:[%s1544_s3 + $0x7c] sm:$0xff] }
 0x154   : > { %v397_v49 = vmax.f32 %v388_v44, 0.0  ;;  %938 = vmatpush.msrb.mxu2 %v920_v41 }
 0x155   : > { %v860_v52 = vrot.slane %v859_v47, 2 }
 0x156   : > { %v405_v54 = vadd.f32 %v397_v49, %v1199_v0  ;;  %v445_v55 = vadd.f32 %v429_v48, %v397_v49  ;;  %v821_v0 = vadd.f32 %v820_v32, %v819_v50  ;;  %939 = vmatpush.msrb.mxu2 %v919_v42  ;;  %v1110_v42 = vld [vmem:[%s1544_s3 + $0x85] ss:$0 sm:$0xff] }
 0x157   : > { %v861_v59 = vadd.f32 %v860_v52, %v859_v47 }
 0x158   : > { %v864_v60 = vsel %vm814_vm2, %v445_v55, 0.0  ;;  %1078 = vmatmul.msk.f32.gmra.mxu2 %vm324_vm1, %v405_v54  ;;  %v885_v11 = vsel %vm797_vm3, %v828_v4, %v821_v0  ;;  %v917_v55 = vld [vmem:[%s1544_s3 + $0x64] sm:$0xff]  ;;  %vm812_vm2 = vcmask 64512  }
 0x159   : > { %v865_v62 = vrot.slane %v864_v60, 4  ;;  %v862_v8 = vrot.slane %v861_v59, 1  ;;  %v886_v14 = vsel %vm799_vm4, %v835_v7, %v885_v11  ;;  %940 = vmatpush.msrb.mxu2 %v918_v43 }
 0x15a   : > { %v887_v17 = vsel %vm801_vm5, %v842_v3, %v886_v14 }
 0x15b   : > { %v866_v6 = vadd.f32 %v865_v62, %v864_v60  ;;  %v863_v15 = vadd.f32 %v862_v8, %v861_v59  ;;  %v888_v2 = vsel %vm803_vm6, %v849_v10, %v887_v17  ;;  %941 = vmatpush.msrb.mxu2 %v917_v55  ;;  %v1107_v59 = vld [vmem:[%s1544_s3 + $0x42] ss:$0 sm:$0xff]  ;;  %v1108_v8 = vld [vmem:[%s1544_s3 + $0x63] ss:$0 sm:$0xff] }
 0x15c   : > { %v889_v19 = vsel %vm805_vm7, %v856_v12, %v888_v2 }
 0x15d   : > { %v867_v9 = vrot.slane %v866_v6, 2  ;;  %v890_v20 = vsel %vm807_vm8, %v863_v15, %v889_v19  ;;  %v605_v19 = vld [vmem:[%s1544_s3 + $0x86] sm:$0x1] }
 0x15e   : > { %1091 = vpush %v605_v19 }
 0x15f   : > { %v868_v13 = vadd.f32 %v867_v9, %v866_v6 }
 0x161   : > { %v869_v16 = vrot.slane %v868_v13, 1 }
 0x163   : > { %v870_v18 = vadd.f32 %v869_v16, %v868_v13 }
 0x165   : > { %v891_v21 = vsel %vm809_vm9, %v870_v18, %v890_v20 }
 0x166   : > { %892 = vrot.lane.b32.xlu2 %v891_v21, %s1153_s22 }
 0x18f   : > { %s1092_s30 = spop %1091 }
 0x1a3   : > { %v493_v27 = vpop.f32.mrf.mxu2 }
 0x1a4   : > { %v494_v28 = vadd.f32 %v1105_v26, %v493_v27 }
 0x1a6   : > { %v517_v29 = vmax.f32 %v494_v28, 0.0 }
 0x1a8   : > { %1079 = vmatmul.msk.f32.vlgmr.msra.gmra.mxu3 %vm324_vm1, %v517_v29 }
 0x1ab   : > { %v496_v30 = vpop.f32.mrf.mxu2 }
 0x1ac   : > { %v497_v31 = vadd.f32 %v1105_v26, %v496_v30 }
 0x1ae   : > { %v518_v33 = vmax.f32 %v497_v31, 0.0 }
 0x1b0   : > { %1080 = vmatmul.msk.f32.gmra.mxu3 %vm324_vm1, %v518_v33 }
 0x1b3   : > { %v499_v34 = vpop.f32.mrf.mxu2 }
 0x1b4   : > { %v500_v35 = vadd.f32 %v1105_v26, %v499_v34 }
 0x1b6   : > { %v519_v36 = vmax.f32 %v500_v35, 0.0 }
 0x1b8   : > { %1081 = vmatmul.msk.f32.gmra.mxu3 %vm324_vm1, %v519_v36 }
 0x1bb   : > { %v502_v37 = vpop.f32.mrf.mxu2 }
 0x1bc   : > { %v503_v38 = vadd.f32 %v1105_v26, %v502_v37 }
 0x1be   : > { %v520_v39 = vmax.f32 %v503_v38, 0.0 }
 0x1c0   : > { %1082 = vmatmul.msk.f32.gmra.mxu3 %vm324_vm1, %v520_v39  ;;  %v893_v40 = vpop.permute.xlu2 %892  ;;  %v1109_v39 = vld [vmem:[%s1544_s3 + $0x84] ss:$0 sm:$0xff] }
 0x1c1   : > { %1087 = vmatmul.msk.f32.vlgmr.msrb.gmra.mxu1 %vm324_vm1, %v893_v40 }
 0x1c3   : > { %v505_v44 = vpop.f32.mrf.mxu2 }
 0x1c4   : > { %v506_v45 = vadd.f32 %v1105_v26, %v505_v44 }
 0x1c6   : > { %v521_v46 = vmax.f32 %v506_v45, 0.0 }
 0x1c8   : > { %1083 = vmatmul.msk.f32.gmra.mxu3 %vm324_vm1, %v521_v46 }
 0x1cb   : > { %v508_v47 = vpop.f32.mrf.mxu2 }
 0x1cc   : > { %v509_v48 = vadd.f32 %v1105_v26, %v508_v47 }
 0x1ce   : > { %v522_v1 = vmax.f32 %v509_v48, 0.0 }
 0x1d0   : > { %1084 = vmatmul.msk.f32.gmra.mxu3 %vm324_vm1, %v522_v1  ;;  %v1415_v1 = vstv %s1092_s30 }
 0x1d3   : > { %v511_v49 = vpop.f32.mrf.mxu2 }
 0x1d4   : > { %v512_v50 = vadd.f32 %v1105_v26, %v511_v49 }
 0x1d6   : > { %v523_v51 = vmax.f32 %v512_v50, 0.0 }
 0x1d8   : > { %1085 = vmatmul.msk.f32.gmra.mxu3 %vm324_vm1, %v523_v51 }
 0x1db   : > { %v514_v52 = vpop.f32.mrf.mxu2 }
 0x1dc   : > { %v515_v53 = vadd.f32 %v1105_v26, %v514_v52 }
 0x1de   : > { %v524_v54 = vmax.f32 %v515_v53, 0.0 }
 0x1e0   : > { %1086 = vmatmul.msk.f32.gmra.mxu3 %vm324_vm1, %v524_v54 }
 0x22b   : > { %v572_v57 = vpop.f32.mrf.mxu3 }
 0x22c   : > { %v573_v58 = vadd.f32 %v1106_v56, %v572_v57 }
 0x22e   : > { %v596_v60 = vmax.f32 %v573_v58, 0.0 }
 0x230   : > { %v607_v32 = vmul.f32 %v1107_v59, %v596_v60 }
 0x232   : > { %v615_v61 = vsel %vm324_vm1, %v607_v32, 0.0 }
 0x233   : > { %616 = vadd.xlane.f32.xlu1 %v615_v61  ;;  %v575_v62 = vpop.f32.mrf.mxu3 }
 0x234   : > { %v576_v63 = vadd.f32 %v1106_v56, %v575_v62 }
 0x236   : > { %v597_v4 = vmax.f32 %v576_v63, 0.0 }
 0x238   : > { %v608_v5 = vmul.f32 %v1107_v59, %v597_v4 }
 0x23a   : > { %v618_v6 = vsel %vm324_vm1, %v608_v5, 0.0 }
 0x23b   : > { %v578_v7 = vpop.f32.mrf.mxu3  ;;  %619 = vadd.xlane.f32.xlu2 %v618_v6 }
 0x23c   : > { %v579_v0 = vadd.f32 %v1106_v56, %v578_v7 }
 0x23e   : > { %v598_v3 = vmax.f32 %v579_v0, 0.0  ;;  %v913_v9 = vpop.f32.mrf.mxu1 }
 0x23f   : > { %v914_v10 = vadd.f32 %v1108_v8, %v913_v9 }
 0x240   : > { %v609_v11 = vmul.f32 %v1107_v59, %v598_v3 }
 0x241   : > { %v916_v12 = vmax.f32 %v914_v10, 0.0 }
 0x242   : > { %v621_v13 = vsel %vm324_vm1, %v609_v11, 0.0 }
 0x243   : > { %v581_v14 = vpop.f32.mrf.mxu3  ;;  %622 = vadd.xlane.f32.xlu2 %v621_v13  ;;  %1088 = vmatmul.msk.f32.vlgmr.msrb.gmra.mxu2 %vm324_vm1, %v916_v12 }
 0x244   : > { %v582_v15 = vadd.f32 %v1106_v56, %v581_v14 }
 0x246   : > { %v599_v16 = vmax.f32 %v582_v15, 0.0 }
 0x248   : > { %v610_v17 = vmul.f32 %v1107_v59, %v599_v16 }
 0x24a   : > { %v624_v2 = vsel %vm324_vm1, %v610_v17, 0.0 }
 0x24b   : > { %625 = vadd.xlane.f32.xlu0 %v624_v2  ;;  %v584_v18 = vpop.f32.mrf.mxu3  ;;  %v1111_v2 = vld [vmem:[%s1544_s3 + $0x86] ss:$0 sm:$0xff] }
 0x24c   : > { %v585_v20 = vadd.f32 %v1106_v56, %v584_v18 }
 0x24e   : > { %v600_v21 = vmax.f32 %v585_v20, 0.0 }
 0x250   : > { %v611_v22 = vmul.f32 %v1107_v59, %v600_v21 }
 0x252   : > { %v627_v23 = vsel %vm324_vm1, %v611_v22, 0.0 }
 0x253   : > { %628 = vadd.xlane.f32.xlu1 %v627_v23  ;;  %v587_v24 = vpop.f32.mrf.mxu3 }
 0x254   : > { %v588_v25 = vadd.f32 %v1106_v56, %v587_v24 }
 0x256   : > { %v601_v26 = vmax.f32 %v588_v25, 0.0 }
 0x258   : > { %v612_v27 = vmul.f32 %v1107_v59, %v601_v26 }
 0x25a   : > { %v630_v28 = vsel %vm324_vm1, %v612_v27, 0.0 }
 0x25b   : > { %v590_v29 = vpop.f32.mrf.mxu3  ;;  %631 = vadd.xlane.f32.xlu2 %v630_v28 }
 0x25c   : > { %v591_v30 = vadd.f32 %v1106_v56, %v590_v29 }
 0x25e   : > { %v602_v31 = vmax.f32 %v591_v30, 0.0 }
 0x260   : > { %v613_v33 = vmul.f32 %v1107_v59, %v602_v31 }
 0x262   : > { %v633_v46 = vsel %vm324_vm1, %v613_v33, 0.0 }
 0x263   : > { %v593_v34 = vpop.f32.mrf.mxu3 }
 0x264   : > { %v594_v35 = vadd.f32 %v1106_v56, %v593_v34 }
 0x266   : > { %v603_v36 = vmax.f32 %v594_v35, 0.0 }
 0x268   : > { %v614_v37 = vmul.f32 %v1107_v59, %v603_v36 }
 0x26a   : > { %v636_v38 = vsel %vm324_vm1, %v614_v37, 0.0 }
 0x26b   : > { %637 = vadd.xlane.f32.xlu1 %v636_v38 }
 0x2a6   : > { %v617_v48 = vpop.xlane.xlu1 %616 }
 0x2a7   : > { %v1418_v50 = vadd.f32 %v1415_v1, %v617_v48 }
 0x2a9   : > { %v659_v54 = vand.u32 2147483647, %v1418_v50 }
 0x2ab   : > { %v667_v60 = vsub.f32 0.0, %v659_v54 }
 0x2ad   : > { %v675_v7 = vmul.f32 1.442695, %v667_v60 }
 0x2ae   : > { %v620_v47 = vpop.xlane.xlu2 %619 }
 0x2af   : > { %v1421_v52 = vadd.f32 %v1415_v1, %v620_v47  ;;  %1112 = vpow2.f32 %v675_v7 }
 0x2b1   : > { %v660_v55 = vand.u32 2147483647, %v1421_v52 }
 0x2b3   : > { %v668_v62 = vsub.f32 0.0, %v660_v55  ;;  %v652_v55 = vmax.f32 %v1421_v52, 0.0 }
 0x2b5   : > { %v677_v0 = vmul.f32 1.442695, %v668_v62  ;;  %v1113_v18 = vpop.eup %1112 }
 0x2b6   : > { %v623_v49 = vpop.xlane.xlu2 %622  ;;  %v691_v22 = vadd.f32 1.0, %v1113_v18  ;;  %v694_v31 = vmul.f32 -0.5, %v1113_v18  ;;  %v697_v33 = vand.u32 2147483647, %v1113_v18 }
 0x2b7   : > { %v1426_v56 = vadd.f32 %v1415_v1, %v623_v49  ;;  %1114 = vpow2.f32 %v677_v0  ;;  %v651_v49 = vmax.f32 %v1418_v50, 0.0 }
 0x2b8   : > { %vm1466_vm10 = vcmp.lt.f32.partialorder %v697_v33, 0.0004427343 }
 0x2b9   : > { %v661_v63 = vand.u32 2147483647, %v1426_v56 }
 0x2bb   : > { %v669_v3 = vsub.f32 0.0, %v661_v63 }
 0x2bd   : > { %v679_v13 = vmul.f32 1.442695, %v669_v3  ;;  %v1115_v19 = vpop.eup %1114 }
 0x2be   : > { %v626_v53 = vpop.xlane.xlu0 %625  ;;  %v700_v24 = vadd.f32 1.0, %v1115_v19  ;;  %v703_v37 = vmul.f32 -0.5, %v1115_v19 }
 0x2bf   : > { %v1429_v58 = vadd.f32 %v1415_v1, %v626_v53  ;;  %1116 = vpow2.f32 %v679_v13  ;;  %v706_v53 = vand.u32 2147483647, %v1115_v19 }
 0x2c0   : > { %v704_v47 = vadd.f32 1.0, %v703_v37 }
 0x2c1   : > { %v662_v4 = vand.u32 2147483647, %v1429_v58  ;;  %vm1481_vm11 = vcmp.lt.f32.partialorder %v706_v53, 0.0004427343 }
 0x2c3   : > { %v670_v9 = vsub.f32 0.0, %v662_v4  ;;  %v653_v4 = vmax.f32 %v1426_v56, 0.0 }
 0x2c5   : > { %v681_v14 = vmul.f32 1.442695, %v670_v9  ;;  %v1448_v25 = vpop.eup %1116 }
 0x2c6   : > { %v943_v40 = vpop.f32.mrf.mxu2  ;;  %v629_v51 = vpop.xlane.xlu1 %628  ;;  %v709_v29 = vadd.f32 1.0, %v1448_v25  ;;  %v712_v48 = vmul.f32 -0.5, %v1448_v25  ;;  %v715_v0 = vand.u32 2147483647, %v1448_v25 }
 0x2c7   : > { %v944_v41 = vadd.f32 %v1109_v39, %v943_v40  ;;  %v1432_v59 = vadd.f32 %v1415_v1, %v629_v51  ;;  %1118 = vpow2.f32 %v681_v14 }
 0x2c8   : > { %v713_v50 = vadd.f32 1.0, %v712_v48  ;;  %vm1492_vm12 = vcmp.lt.f32.partialorder %v715_v0, 0.0004427343 }
 0x2c9   : > { %v946_v43 = vmax.f32 %v944_v41, 0.0  ;;  %v663_v5 = vand.u32 2147483647, %v1432_v59  ;;  %v787_v41 = vlaneseq }
 0x2cb   : > { %v950_v44 = vmul.f32 %v1110_v42, %v946_v43  ;;  %v671_v10 = vsub.f32 0.0, %v663_v5 }
 0x2cd   : > { %v951_v45 = vsel %vm324_vm1, %v950_v44, 0.0  ;;  %v683_v15 = vmul.f32 1.442695, %v671_v10  ;;  %v1450_v26 = vpop.eup %1118  ;;  %v695_v44 = vadd.f32 1.0, %v694_v31 }
 0x2ce   : > { %952 = vadd.xlane.f32.xlu0 %v951_v45  ;;  %v632_v57 = vpop.xlane.xlu2 %631  ;;  %v718_v30 = vadd.f32 1.0, %v1450_v26  ;;  %v721_v54 = vmul.f32 -0.5, %v1450_v26  ;;  %v724_v56 = vand.u32 2147483647, %v1450_v26 }
 0x2cf   : > { %v1435_v32 = vadd.f32 %v1415_v1, %v632_v57  ;;  %1120 = vpow2.f32 %v683_v15  ;;  %v696_v63 = vmul.f32 %v1113_v18, %v695_v44 }
 0x2d0   : > { %v722_v10 = vadd.f32 1.0, %v721_v54  ;;  %vm1501_vm13 = vcmp.lt.f32.partialorder %v724_v56, 0.0004427343 }
 0x2d1   : > { %v664_v8 = vand.u32 2147483647, %v1435_v32  ;;  %v656_v48 = vmax.f32 %v1435_v32, 0.0 }
 0x2d3   : > { %v672_v12 = vsub.f32 0.0, %v664_v8  ;;  %v705_v8 = vmul.f32 %v1115_v19, %v704_v47  ;;  %v714_v19 = vmul.f32 %v1448_v25, %v713_v50 }
 0x2d5   : > { %v685_v17 = vmul.f32 1.442695, %v672_v12  ;;  %v1452_v27 = vpop.eup %1120 }
 0x2d6   : > { %634 = vadd.xlane.f32.xlu0 %v633_v46  ;;  %v727_v34 = vadd.f32 1.0, %v1452_v27  ;;  %v730_v60 = vmul.f32 -0.5, %v1452_v27  ;;  %v733_v15 = vand.u32 2147483647, %v1452_v27 }
 0x2d7   : > { %1122 = vpow2.f32 %v685_v17 }
 0x2d8   : > { %v731_v14 = vadd.f32 1.0, %v730_v60  ;;  %vm1506_vm14 = vcmp.lt.f32.partialorder %v733_v15, 0.0004427343 }
 0x2dd   : > { %v1454_v28 = vpop.eup %1122 }
 0x2de   : > { %v638_v61 = vpop.xlane.xlu1 %637  ;;  %v736_v38 = vadd.f32 1.0, %v1454_v28  ;;  %v739_v5 = vmul.f32 -0.5, %v1454_v28 }
 0x2df   : > { %v1441_v6 = vadd.f32 %v1415_v1, %v638_v61 }
 0x2e1   : > { %v666_v11 = vand.u32 2147483647, %v1441_v6 }
 0x2e3   : > { %v674_v16 = vsub.f32 0.0, %v666_v11 }
 0x2e5   : > { %v689_v20 = vmul.f32 1.442695, %v674_v16  ;;  %v654_v16 = vmax.f32 %v1429_v58, 0.0 }
 0x2e7   : > { %1124 = vpow2.f32 %v689_v20 }
 0x2e8   : > { %1126 = vlog2.f32 %v691_v22  ;;  %v742_v22 = vand.u32 2147483647, %v1454_v28 }
 0x2e9   : > { %1128 = vlog2.f32 %v700_v24 }
 0x2ea   : > { %1130 = vlog2.f32 %v709_v29  ;;  %v723_v29 = vmul.f32 %v1450_v26, %v722_v10  ;;  %vm743_vm15 = vcmp.lt.f32.partialorder %v742_v22, 0.0004427343 }
 0x2eb   : > { %1132 = vlog2.f32 %v718_v30  ;;  %v655_v30 = vmax.f32 %v1432_v59, 0.0 }
 0x2ec   : > { %1134 = vlog2.f32 %v727_v34  ;;  %v732_v34 = vmul.f32 %v1452_v27, %v731_v14 }
 0x2ed   : > { %v1459_v36 = vpop.eup %1124  ;;  %1136 = vlog2.f32 %v736_v38 }
 0x2ee   : > { %v1127_v40 = vpop.eup %1126  ;;  %v754_v46 = vadd.f32 1.0, %v1459_v36  ;;  %v757_v18 = vmul.f32 -0.5, %v1459_v36 }
 0x2ef   : > { %v1129_v43 = vpop.eup %1128  ;;  %v693_v51 = vmul.f32 0.6931472, %v1127_v40 }
 0x2f0   : > { %v702_v57 = vmul.f32 0.6931472, %v1129_v43  ;;  %v1131_v62 = vpop.eup %1130  ;;  %1138 = vlog2.f32 %v754_v46  ;;  %v758_v37 = vadd.f32 1.0, %v757_v18 }
 0x2f1   : > { %v1133_v7 = vpop.eup %1132  ;;  %v699_v52 = vsel %vm1466_vm10, %v696_v63, %v693_v51  ;;  %v711_v13 = vmul.f32 0.6931472, %v1131_v62  ;;  %v658_v63 = vmax.f32 %v1441_v6, 0.0 }
 0x2f2   : > { %v1135_v3 = vpop.eup %1134  ;;  %v708_v12 = vsel %vm1481_vm11, %v705_v8, %v702_v57  ;;  %v720_v17 = vmul.f32 0.6931472, %v1133_v7  ;;  %v763_v46 = vadd.f32 %v699_v52, %v651_v49  ;;  %v759_v51 = vmul.f32 %v1459_v36, %v758_v37 }
 0x2f3   : > { %v1137_v11 = vpop.eup %1136  ;;  %v764_v24 = vadd.f32 %v708_v12, %v652_v55  ;;  %v717_v33 = vsel %vm1492_vm12, %v714_v19, %v711_v13  ;;  %v788_v55 = vand.u32 127, %v787_v41 }
 0x2f4   : > { %v738_v58 = vmul.f32 0.6931472, %v1137_v11  ;;  %v726_v26 = vsel %vm1501_vm13, %v723_v29, %v720_v17  ;;  %v765_v44 = vadd.f32 %v717_v33, %v653_v4  ;;  %v771_v62 = vadd.f32 1e-20, %v763_v46 }
 0x2f5   : > { %v766_v47 = vadd.f32 %v726_v26, %v654_v16 }
 0x2f6   : > { %v773_v57 = vadd.f32 1e-20, %v765_v44 }
 0x2f7   : > { %v774_v49 = vadd.f32 1e-20, %v766_v47 }
 0x2f8   : > { %v791_v0 = vperm.slane %v773_v57, %v788_v55 }
 0x2f9   : > { %v792_v52 = vperm.slane %v774_v49, %v788_v55 }
 0x341   : > { %v953_v21 = vpop.xlane.xlu0 %952 }
 0x342   : > { %v955_v23 = vadd.f32 %v1111_v2, %v953_v21  ;;  %v740_v2 = vadd.f32 1.0, %v739_v5  ;;  %v729_v21 = vmul.f32 0.6931472, %v1135_v3  ;;  %v789_v3 = vperm.slane %v771_v62, %v788_v55 }
 0x344   : > { %957 = vrot.lane.b32.xlu2 %v955_v23, %s1154_s8  ;;  %v1139_v23 = vpop.eup %1138  ;;  %v741_v59 = vmul.f32 %v1454_v28, %v740_v2  ;;  %v735_v40 = vsel %vm1506_vm14, %v732_v34, %v729_v21 }
 0x345   : > { %v756_v45 = vmul.f32 0.6931472, %v1139_v23  ;;  %v767_v28 = vadd.f32 %v735_v40, %v655_v30 }
 0x346   : > { %v744_v27 = vsel %vm743_vm15, %v741_v59, %v738_v58 }
 0x347   : > { %v768_v53 = vadd.f32 %v744_v27, %v656_v48  ;;  %v775_v5 = vadd.f32 1e-20, %v767_v28 }
 0x349   : > { %v635_v35 = vpop.xlane.xlu0 %634  ;;  %v776_v7 = vadd.f32 1e-20, %v768_v53  ;;  %v793_v10 = vperm.slane %v775_v5, %v788_v55 }
 0x34a   : > { %v1463_v39 = vadd.f32 %v1415_v1, %v635_v35 }
 0x34b   : > { %v794_v11 = vperm.slane %v776_v7, %v788_v55 }
 0x34c   : > { %v665_v42 = vand.u32 2147483647, %v1463_v39  ;;  %v657_v41 = vmax.f32 %v1463_v39, 0.0 }
 0x34e   : > { %v673_v1 = vsub.f32 0.0, %v665_v42  ;;  %v760_v42 = vand.u32 2147483647, %v1459_v36 }
 0x350   : > { %v687_v61 = vmul.f32 1.442695, %v673_v1  ;;  %v772_v1 = vadd.f32 1e-20, %v764_v24  ;;  %vm761_vm0 = vcmp.lt.f32.partialorder %v760_v42, 0.0004427343 }
 0x351   : > { %v762_v60 = vsel %vm761_vm0, %v759_v51, %v756_v45 }
 0x352   : > { %1140 = vpow2.f32 %v687_v61  ;;  %v790_v4 = vperm.slane %v772_v1, %v788_v55  ;;  %v770_v36 = vadd.f32 %v762_v60, %v658_v63 }
 0x354   : > { %v798_v6 = vsel %vm797_vm3, %v790_v4, %v789_v3  ;;  %v778_v12 = vadd.f32 1e-20, %v770_v36  ;;  %vm960_vm3 = vcmask 7168  }
 0x355   : > { %v800_v13 = vsel %vm799_vm4, %v791_v0, %v798_v6 }
 0x356   : > { %v802_v15 = vsel %vm801_vm5, %v792_v52, %v800_v13  ;;  %v796_v2 = vperm.slane %v778_v12, %v788_v55 }
 0x357   : > { %v804_v39 = vsel %vm803_vm6, %v793_v10, %v802_v15 }
 0x358   : > { %v1141_v31 = vpop.eup %1140  ;;  %v806_v17 = vsel %vm805_vm7, %v794_v11, %v804_v39 }
 0x359   : > { %v745_v38 = vadd.f32 1.0, %v1141_v31  ;;  %v748_v43 = vmul.f32 -0.5, %v1141_v31  ;;  %v751_v61 = vand.u32 2147483647, %v1141_v31 }
 0x35b   : > { %1142 = vlog2.f32 %v745_v38  ;;  %v749_v54 = vadd.f32 1.0, %v748_v43  ;;  %vm752_vm1 = vcmp.lt.f32.partialorder %v751_v61, 0.0004427343 }
 0x35d   : > { %v750_v50 = vmul.f32 %v1141_v31, %v749_v54 }
 0x361   : > { %v1143_v32 = vpop.eup %1142 }
 0x362   : > { %v747_v8 = vmul.f32 0.6931472, %v1143_v32 }
 0x364   : > { %v753_v9 = vsel %vm752_vm1, %v750_v50, %v747_v8 }
 0x365   : > { %v769_v56 = vadd.f32 %v753_v9, %v657_v41 }
 0x367   : > { %v777_v14 = vadd.f32 1e-20, %v769_v56 }
 0x369   : > { %v795_v16 = vperm.slane %v777_v14, %v788_v55 }
 0x36b   : > { %v808_v18 = vsel %vm807_vm8, %v795_v16, %v806_v17 }
 0x36c   : > { %v810_v19 = vsel %vm809_vm9, %v796_v2, %v808_v18 }
 0x36d   : > { %813 = vst.msk [vmem:[%s231_s12] sm:$0xff] %vm812_vm2, %v810_v19 }
 0x39e   : > { %v958_v20 = vpop.permute.xlu2 %957 }
 0x39f   : > { %961 = vst.msk [vmem:[%s235_s14] sm:$0xff] %vm960_vm3, %v958_v20 }
 0x3a0 PF: > { %s16_s18 = sadd.s32 1, %s1150_s18  }
 0x3a1   : > { %p13_p5 = scmp.ge.s32.totalorder %s16_s18, 4  }
 0x3a3   :  { %15 = sbr.rel (!%p13_p5) target bundleno = 1 (0x1), region = 78 }

</bundles_post_ra>
